<compile_context>
chip_gen: v7x
topology: tpu7x:2x2x1
jax: 0.10.0
libtpu: 0.0.40
codegen_flags: <defaults>
</compile_context>

<pallas_src>
import jax
import jax.numpy as jnp
from jax import lax
from jax.experimental import pallas as pl
from jax.experimental.pallas import tpu as pltpu


def _round_up(a, b):
    return (a + b - 1) // b * b


def _vmem_capacity_bytes():
    try:
        cap = int(pltpu.get_tpu_info().vmem_capacity_bytes)
        if cap > 0:
            return cap
    except Exception:
        pass
    return 64 * 1024 * 1024  # conservative default: v7x per-TensorCore VMEM


def _lm_criterion_kernel(x_ref, tgt_ref, msk_ref, nll_ref, msum_ref, acc_ref):
    v_idx = pl.program_id(1)
    n_v = pl.num_programs(1)

    x = x_ref[...]                                  # (ROWS_TILE, V_TILE), native dtype
    rows, vt = x.shape

    # Fold the vocab-tile offset into the target (a (rows,1) op) rather than
    # offsetting the full-tile iota.  gather(input, 2, target) == exact one-hot
    # select + lane reduce; sentinel (-1) targets and over-read (ragged-edge)
    # columns are never selected, so they contribute exactly 0 (NaN in
    # unselected lanes cannot leak through jnp.where).
    tgt_local = tgt_ref[...] - v_idx * vt           # (ROWS_TILE, 1) int32
    onehot = lax.broadcasted_iota(jnp.int32, (rows, vt), 1) == tgt_local
    picked = jnp.sum(jnp.where(onehot, x, jnp.zeros((), x.dtype)),
                     axis=-1, keepdims=True).astype(jnp.float32)

    @pl.when(v_idx == 0)
    def _init():
        acc_ref[...] = picked

    @pl.when(v_idx > 0)
    def _accumulate():
        acc_ref[...] = acc_ref[...] + picked

    @pl.when(v_idx == n_v - 1)
    def _finalize():
        msk = msk_ref[...]                          # (ROWS_TILE, 1) f32; padded rows are 0
        nll_ref[...] = jnp.full(nll_ref.shape, jnp.sum(-acc_ref[...] * msk), jnp.float32)
        msum_ref[...] = jnp.full(msum_ref.shape, jnp.sum(msk), jnp.float32)


def language_model_criterion(inp, target, mask, *, rows_tile=None, v_tile=None):
    """Pallas TPU implementation of LanguageModelCriterion.forward.

    inp:    (B, T, V) float32/bfloat16 log-probabilities
    target: (B, Tmax) int token indices (Tmax >= T)
    mask:   (B, Tmax) float mask (Tmax >= T)
    returns scalar float32
    """
    B, T, V = inp.shape
    R = B * T

    # Glue (PyTorch: target[:, :T], mask[:, :T]) + flatten rows.
    tgt = target[:, :T].astype(jnp.int32).reshape(R)
    msk = mask[:, :T].astype(jnp.float32).reshape(R)
    x = inp.reshape(R, V)                  # stream in the native dtype, unpadded
    itemsize = jnp.dtype(x.dtype).itemsize

    # Packed-sublane row alignment: 8 for f32, 16 for bf16, 32 for int8/fp8.
    row_align = 8 * max(1, 4 // itemsize)

    # ---- tile selection --------------------------------------------------
    if v_tile is None:
        v_tile = int(min(_round_up(V, 128), 4096))
    v_tile = int(_round_up(int(v_tile), 128))
    n_v_tiles = int(pl.cdiv(V, v_tile))

    vmem_cap = _vmem_capacity_bytes()
    if rows_tile is None:
        # Double-buffered x tiles target ~40% of VMEM (leaves headroom for the
        # tiny tgt/msk/output/scratch buffers).
        budget = int(vmem_cap * 0.4)
        cap = max(row_align,
                  (budget // (2 * v_tile * itemsize)) // row_align * row_align)
        # Keep at least two row tiles when R allows it so the "parallel" row
        # axis feeds both TensorCores on v7x.
        half = _round_up(max(-(-R // 2), 1), row_align)
        rows_tile = int(min(2048, cap, half, _round_up(R, row_align)))
    rows_tile = int(_round_up(int(rows_tile), row_align))

    R_pad = _round_up(R, rows_tile)
    n_row_tiles = R_pad // rows_tile

    # Pad ONLY the tiny per-row arrays.  Padded rows get a -1 sentinel target
    # (selects nothing) and a 0 mask, so they contribute exactly 0; the big
    # log-prob tensor is left untouched and its ragged edge tiles over-read.
    if R_pad != R:
        tgt = jnp.pad(tgt, (0, R_pad - R), constant_values=-1)
        msk = jnp.pad(msk, (0, R_pad - R))
    tgt = tgt.reshape(R_pad, 1)
    msk = msk.reshape(R_pad, 1)

    cost = pl.CostEstimate(
        flops=2 * R * V,                   # compare + select, roughly
        transcendentals=0,
        bytes_accessed=R * V * itemsize + R_pad * 8
        + n_row_tiles * 2 * 8 * 128 * 4,
    )

    out_nll, out_msum = pl.pallas_call(
        _lm_criterion_kernel,
        out_shape=(
            jax.ShapeDtypeStruct((n_row_tiles, 8, 128), jnp.float32),
            jax.ShapeDtypeStruct((n_row_tiles, 8, 128), jnp.float32),
        ),
        grid=(n_row_tiles, n_v_tiles),
        in_specs=[
            pl.BlockSpec((rows_tile, v_tile), lambda r, v: (r, v)),
            pl.BlockSpec((rows_tile, 1), lambda r, v: (r, 0)),
            pl.BlockSpec((rows_tile, 1), lambda r, v: (r, 0)),
        ],
        out_specs=(
            pl.BlockSpec((1, 8, 128), lambda r, v: (r, 0, 0)),
            pl.BlockSpec((1, 8, 128), lambda r, v: (r, 0, 0)),
        ),
        scratch_shapes=[pltpu.VMEM((rows_tile, 1), jnp.float32)],
        compiler_params=pltpu.CompilerParams(
            dimension_semantics=("parallel", "arbitrary"),
            vmem_limit_bytes=int(min(vmem_cap * 0.75, 100 * 1024 * 1024)),
        ),
        cost_estimate=cost,
    )(x, tgt, msk)

    total_nll = jnp.sum(out_nll[:, 0, 0])
    total_msk = jnp.sum(out_msum[:, 0, 0])
    # TODO(synk): like the PyTorch module, this divides by sum(mask) with no
    # guard for an all-zero mask.
    return total_nll / total_msk


if __name__ == "__main__":
    key = jax.random.PRNGKey(0)

    def _ref(logprobs, target, mask):
        T = logprobs.shape[1]
        tgt_s = target[:, :T].astype(jnp.int32)
        msk_s = mask[:, :T].astype(jnp.float32)
        picked = jnp.take_along_axis(
            logprobs.astype(jnp.float32), tgt_s[:, :, None], axis=2)[:, :, 0]
        return jnp.sum(-picked * msk_s) / jnp.sum(msk_s)

    # Case 1: small aligned shapes, auto tiles (>=2 row tiles -> parallel axis).
    B, T, Tmax, V = 2, 8, 10, 128
    k1, k2, k3, k4 = jax.random.split(key, 4)
    logprobs = jax.nn.log_softmax(
        jax.random.normal(k1, (B, T, V), dtype=jnp.float32), axis=-1)
    target = jax.random.randint(k2, (B, Tmax), 0, V, dtype=jnp.int32)
    mask = (jax.random.uniform(k3, (B, Tmax)) > 0.3).astype(jnp.float32)
    mask = mask.at[0, 0].set(1.0)
    loss = jax.block_until_ready(language_model_criterion(logprobs, target, mask))
    ref = _ref(logprobs, target, mask)
    assert jnp.allclose(loss, ref, rtol=1e-5, atol=1e-5), (loss, ref)

    # Case 2: unaligned shapes + forced small tiles -> ragged row tile with
    # sentinel targets, ragged vocab tile (over-read columns) and the
    # multi-vocab-tile VMEM accumulator / pl.when finalize path.
    B, T, Tmax, V = 2, 9, 12, 300
    k1, k2, k3, k5 = jax.random.split(k4, 4)
    logprobs = jax.nn.log_softmax(
        jax.random.normal(k1, (B, T, V), dtype=jnp.float32), axis=-1)
    target = jax.random.randint(k2, (B, Tmax), 0, V, dtype=jnp.int32)
    mask = (jax.random.uniform(k3, (B, Tmax)) > 0.3).astype(jnp.float32)
    mask = mask.at[0, 0].set(1.0)
    loss2 = jax.block_until_ready(
        language_model_criterion(logprobs, target, mask, rows_tile=8, v_tile=128))
    ref2 = _ref(logprobs, target, mask)
    assert jnp.allclose(loss2, ref2, rtol=1e-5, atol=1e-5), (loss2, ref2)

    # Case 3: bfloat16 log-probs, unaligned shapes, auto tiles (native-dtype
    # select on the wire, packed-sublane row alignment of 16).
    B, T, Tmax, V = 3, 7, 9, 260
    k1, k2, k3 = jax.random.split(k5, 3)
    logprobs_bf16 = jax.nn.log_softmax(
        jax.random.normal(k1, (B, T, V), dtype=jnp.float32), axis=-1
    ).astype(jnp.bfloat16)
    target = jax.random.randint(k2, (B, Tmax), 0, V, dtype=jnp.int32)
    mask = (jax.random.uniform(k3, (B, Tmax)) > 0.3).astype(jnp.float32)
    mask = mask.at[0, 0].set(1.0)
    loss3 = jax.block_until_ready(
        language_model_criterion(logprobs_bf16, target, mask))
    ref3 = _ref(logprobs_bf16, target, mask)
    assert jnp.allclose(loss3, ref3, rtol=1e-4, atol=1e-4), (loss3, ref3)

    print("KERNEL_OK")
</pallas_src>

<mosaic_0001>
module attributes {stable_mosaic.version = 11 : i64} {
  func.func @_lm_criterion_kernel(%arg0: i32, %arg1: i32, %arg2: memref<8x128xf32, #tpu.memory_space<vmem>>, %arg3: memref<8x1xi32, #tpu.memory_space<vmem>>, %arg4: memref<8x1xf32, #tpu.memory_space<vmem>>, %arg5: memref<1x8x128xf32, #tpu.memory_space<vmem>>, %arg6: memref<1x8x128xf32, #tpu.memory_space<vmem>>, %arg7: memref<8x1xf32, #tpu.memory_space<vmem>>) attributes {dimension_semantics = [#tpu.dimension_semantics<parallel>, #tpu.dimension_semantics<arbitrary>], iteration_bounds = array<i64: 2, 1>, scalar_prefetch = 0 : i64, scratch_operands = 1 : i64, tpu.core_type = #tpu.core_type<tc>, window_params = [{transform_indices = @transform_0, window_bounds = array<i64: 8, 128>}, {transform_indices = @transform_1, window_bounds = array<i64: 8, 1>}, {transform_indices = @transform_2, window_bounds = array<i64: 8, 1>}, {transform_indices = @transform_3, window_bounds = array<i64: 1, 8, 128>}, {transform_indices = @transform_4, window_bounds = array<i64: 1, 8, 128>}]} {
    %c0 = arith.constant 0 : index
    %c0_0 = arith.constant 0 : index
    %0 = vector.load %arg2[%c0, %c0_0] : memref<8x128xf32, #tpu.memory_space<vmem>>, vector<8x128xf32>
    %c0_1 = arith.constant 0 : index
    %c0_2 = arith.constant 0 : index
    %1 = vector.load %arg3[%c0_1, %c0_2] : memref<8x1xi32, #tpu.memory_space<vmem>>, vector<8x1xi32>
    %c128_i32 = arith.constant 128 : i32
    %2 = arith.muli %arg1, %c128_i32 : i32
    %3 = vector.broadcast %2 : i32 to vector<8x1xi32>
    %4 = arith.subi %1, %3 : vector<8x1xi32>
    %5 = tpu.iota {dimensions = array<i32: 1>} : vector<8x128xi32>
    %6 = vector.broadcast %4 : vector<8x1xi32> to vector<8x128xi32>
    %7 = arith.cmpi eq, %5, %6 : vector<8x128xi32>
    %cst = arith.constant 0.000000e+00 : f32
    %8 = vector.broadcast %cst : f32 to vector<8x128xf32>
    %9 = arith.select %7, %0, %8 : vector<8x128xi1>, vector<8x128xf32>
    %cst_3 = arith.constant dense<0.000000e+00> : vector<8xf32>
    %10 = vector.multi_reduction <add>, %9, %cst_3 [1] : vector<8x128xf32> to vector<8xf32>
    %11 = vector.shape_cast %10 : vector<8xf32> to vector<8x1xf32>
    %c0_i32 = arith.constant 0 : i32
    %12 = arith.cmpi eq, %arg1, %c0_i32 : i32
    %13 = arith.extui %12 : i1 to i32
    %c0_i32_4 = arith.constant 0 : i32
    %14 = arith.cmpi ne, %13, %c0_i32_4 : i32
    scf.if %14 {
      %c0_9 = arith.constant 0 : index
      %c0_10 = arith.constant 0 : index
      %21 = vector.load %arg7[%c0_9, %c0_10] : memref<8x1xf32, #tpu.memory_space<vmem>>, vector<8x1xf32>
      tpu.vector_store %arg7[%c0_9, %c0_10], %11 {strides = array<i32>} : memref<8x1xf32, #tpu.memory_space<vmem>>, vector<8x1xf32>,
    } else {
    }
    %c0_i32_5 = arith.constant 0 : i32
    %15 = arith.cmpi sgt, %arg1, %c0_i32_5 : i32
    %16 = arith.extui %15 : i1 to i32
    %c0_i32_6 = arith.constant 0 : i32
    %17 = arith.cmpi ne, %16, %c0_i32_6 : i32
    scf.if %17 {
      %c0_9 = arith.constant 0 : index
      %c0_10 = arith.constant 0 : index
      %21 = vector.load %arg7[%c0_9, %c0_10] : memref<8x1xf32, #tpu.memory_space<vmem>>, vector<8x1xf32>
      %22 = arith.addf %21, %11 : vector<8x1xf32>
      %c0_11 = arith.constant 0 : index
      %c0_12 = arith.constant 0 : index
      %23 = vector.load %arg7[%c0_11, %c0_12] : memref<8x1xf32, #tpu.memory_space<vmem>>, vector<8x1xf32>
      tpu.vector_store %arg7[%c0_11, %c0_12], %22 {strides = array<i32>} : memref<8x1xf32, #tpu.memory_space<vmem>>, vector<8x1xf32>,
    } else {
    }
    %c0_i32_7 = arith.constant 0 : i32
    %18 = arith.cmpi eq, %arg1, %c0_i32_7 : i32
    %19 = arith.extui %18 : i1 to i32
    %c0_i32_8 = arith.constant 0 : i32
    %20 = arith.cmpi ne, %19, %c0_i32_8 : i32
    scf.if %20 {
      %c0_9 = arith.constant 0 : index
      %c0_10 = arith.constant 0 : index
      %21 = vector.load %arg4[%c0_9, %c0_10] : memref<8x1xf32, #tpu.memory_space<vmem>>, vector<8x1xf32>
      %c0_11 = arith.constant 0 : index
      %c0_12 = arith.constant 0 : index
      %22 = vector.load %arg7[%c0_11, %c0_12] : memref<8x1xf32, #tpu.memory_space<vmem>>, vector<8x1xf32>
      %cst_13 = arith.constant 0.000000e+00 : f32
      %23 = vector.broadcast %cst_13 : f32 to vector<8x1xf32>
      %24 = arith.subf %23, %22 : vector<8x1xf32>
      %25 = arith.mulf %24, %21 : vector<8x1xf32>
      %26 = vector.shape_cast %25 : vector<8x1xf32> to vector<1x8x1xf32>
      %cst_14 = arith.constant dense<0.000000e+00> : vector<1xf32>
      %27 = vector.multi_reduction <add>, %26, %cst_14 [1, 2] : vector<1x8x1xf32> to vector<1xf32>
      %28 = vector.shape_cast %27 : vector<1xf32> to vector<1x1x1xf32>
      %29 = vector.extract %28[0, 0, 0] : f32 from vector<1x1x1xf32>
      %30 = vector.broadcast %29 : f32 to vector<1x8x128xf32>
      %c0_15 = arith.constant 0 : index
      %c0_16 = arith.constant 0 : index
      %c0_17 = arith.constant 0 : index
      %31 = vector.load %arg5[%c0_15, %c0_16, %c0_17] : memref<1x8x128xf32, #tpu.memory_space<vmem>>, vector<1x8x128xf32>
      tpu.vector_store %arg5[%c0_15, %c0_16, %c0_17], %30 {strides = array<i32>} : memref<1x8x128xf32, #tpu.memory_space<vmem>>, vector<1x8x128xf32>,
      %32 = vector.shape_cast %21 : vector<8x1xf32> to vector<1x8x1xf32>
      %cst_18 = arith.constant dense<0.000000e+00> : vector<1xf32>
      %33 = vector.multi_reduction <add>, %32, %cst_18 [1, 2] : vector<1x8x1xf32> to vector<1xf32>
      %34 = vector.shape_cast %33 : vector<1xf32> to vector<1x1x1xf32>
      %35 = vector.extract %34[0, 0, 0] : f32 from vector<1x1x1xf32>
      %36 = vector.broadcast %35 : f32 to vector<1x8x128xf32>
      %c0_19 = arith.constant 0 : index
      %c0_20 = arith.constant 0 : index
      %c0_21 = arith.constant 0 : index
      %37 = vector.load %arg6[%c0_19, %c0_20, %c0_21] : memref<1x8x128xf32, #tpu.memory_space<vmem>>, vector<1x8x128xf32>
      tpu.vector_store %arg6[%c0_19, %c0_20, %c0_21], %36 {strides = array<i32>} : memref<1x8x128xf32, #tpu.memory_space<vmem>>, vector<1x8x128xf32>,
    } else {
    }
    return
  }
  func.func @transform_0(%arg0: i32, %arg1: i32) -> (i32, i32) {
    %c0_i32 = arith.constant 0 : i32
    return %arg0, %arg1 : i32, i32
  }
  func.func @transform_1(%arg0: i32, %arg1: i32) -> (i32, i32) {
    %c0_i32 = arith.constant 0 : i32
    %c0_i32_0 = arith.constant 0 : i32
    return %arg0, %c0_i32 : i32, i32
  }
  func.func @transform_2(%arg0: i32, %arg1: i32) -> (i32, i32) {
    %c0_i32 = arith.constant 0 : i32
    %c0_i32_0 = arith.constant 0 : i32
    return %arg0, %c0_i32 : i32, i32
  }
  func.func @transform_3(%arg0: i32, %arg1: i32) -> (i32, i32, i32) {
    %c0_i32 = arith.constant 0 : i32
    %c0_i32_0 = arith.constant 0 : i32
    %c0_i32_1 = arith.constant 0 : i32
    return %arg0, %c0_i32, %c0_i32_0 : i32, i32, i32
  }
  func.func @transform_4(%arg0: i32, %arg1: i32) -> (i32, i32, i32) {
    %c0_i32 = arith.constant 0 : i32
    %c0_i32_0 = arith.constant 0 : i32
    %c0_i32_1 = arith.constant 0 : i32
    return %arg0, %c0_i32, %c0_i32_0 : i32, i32, i32
  }
}

</mosaic_0001>

<bundles_post_ra>
// kernel: tpu_custom_call.1
= control target key start
LH: loop header
LB: loop body
LE: loop exit
PB: predicated region body
PF: predicated region fallthrough
CT: control target
= control target key end

     0   :  { %10 = vsyncpa [#allocation4], 0  ;;  %s860_s0 = inlined_call_operand.vmem [shape: f32[16,128], index: 0, kind: input, shape index: {}]   ;;  %s861_s1 = inlined_call_operand.vmem [shape: s32[16,1], index: 1, kind: input, shape index: {}]   ;;  %s862_s2 = inlined_call_operand.vmem [shape: f32[16,1], index: 2, kind: input, shape index: {}]   ;;  %s863_s3 = inlined_call_operand.hbm [shape: f32[2,8,128], index: 3, kind: output, shape index: {0}]   ;;  %s864_s4 = inlined_call_operand.hbm [shape: f32[2,8,128], index: 4, kind: output, shape index: {1}]  }
   0x1   :  { %12 = vsyncpa [#allocation4 + $0x1], 0 }
   0x2   :  { %13 = vsyncpa [#allocation6], 0 }
   0x3   :  { %15 = vsyncpa [#allocation6 + $0x1], 0  ;;  %s701_s15 = smov 0   ;;  %s703_s16 = smov 0  }
   0x4   :  { %s705_s17 = smov 0   ;;  %s707_s18 = smov 0  }
   0x5   :  { %s709_s19 = smov 0   ;;  %s711_s20 = smov 0  }
   0x6 LB: > { %s479_s21 = sadd.s32 4294967295, %s671_s20   ;;  %s480_s22 = sadd.s32 4294967294, %s671_s20   ;;  %s671_s20 = sphi %s711_s20, %s21_s20   ;;  %s667_s19 = sphi %s709_s19, %s871_s19   ;;  %s663_s18 = sphi %s707_s18, %s870_s18   ;;  %s659_s17 = sphi %s705_s17, %s869_s17   ;;  %s655_s16 = sphi %s703_s16, %s868_s16   ;;  %s651_s15 = sphi %s701_s15, %s867_s15  }
   0x7   : > { %s33_s23 = sadd.s32 1, %s667_s19  ;;  %s120_s24 = sadd.s32 1, %s659_s17 }
   0x8   : > { %p35_p0 = scmp.ge.s32.totalorder %s33_s23, 2  ;;  %p130_p1 = scmp.ne.s32.totalorder %s659_s17, %s655_s16 }
   0x9   : > { %p131_p2 = scmp.eq.s32.totalorder %s479_s21, 1  ;;  %p136_p3 = scmp.ne.s32.totalorder %s655_s16, %s651_s15 }
   0xa   : > { %s873_s23 = smov (%p35_p0, %s33_s23), 0  ;;  %p137_p5 = scmp.eq.s32.totalorder %s480_s22, 1 }
   0xb   : > { %p741_p4 = por %p131_p2, %p130_p1  ;;  %s117_s26 = ssub.s32 %s667_s19, %s873_s23 }
   0xc   : > { %p483_p6 = scmp.ge.s32.totalorder %s671_s20, 1  ;;  %p118_p7 = scmp.eq.s32.totalorder %s117_s26, 0 }
   0xd   : > { %p748_p8 = por %p137_p5, %p136_p3  ;;  %p205_p9 = scmp.lt.s32.totalorder %s671_s20, 3 }
   0xe   : > { %s754_s28 = scalar_select %p118_p7, %s659_s17, %s120_s24  }
   0xf   : > { %p206_p10 = pnand %p483_p6, %p205_p9 }
  0x10   : > { %p246_p11 = scmp.lt.s32.totalorder (!%p206_p10), %s663_s18, 1  ;;  %v673_v0 = vmov (!%p206_p10), 0   ;;  %v266_v2 = vlaneseq (!%p206_p10)  ;;  %vm279_vm1 = vcmask (!%p206_p10), 7168   ;;  %s768_s14 = sand.u32 (!%p206_p10), 1, %s655_s16  }
  0x11   : > { %209 = sbr.rel (%p206_p10) target bundleno = 557 (0x22d), region = 32  ;;  %560 = vset.pattern.permute.xlu0 (!%p206_p10), %v673_v0  ;;  %s484_s21 = sshll.u32 (!%p206_p10), %s768_s14, 3 }
  0x12   : > { %v267_v3 = vand.u32 (!%p206_p10), 127, %v266_v2  ;;  %s491_s22 = sshll.u32 (!%p206_p10), %s663_s18, 7  ;;  %s238_s24 = scalar_lea.vmem (!%p206_p10), [#allocation3], %s484_s21 }
  0x13   : > { %s340_s26 = sshll.u32 (!%p206_p10), %s238_s24, 4  ;;  %s322_s9 = scalar_lea.sflag (!%p206_p10), [#allocation4], %s768_s14  ;;  %s782_s26 = int_to_ptr.vmem [resolvable:$true] %s340_s26 }
  0x14   : > { %s674_s11 = smov (!%p206_p10), [#allocation3]  }
  0x15   : > { %s565_s12 = sshll.u32 (!%p206_p10), %s674_s11, 4  ;;  %s566_s12 = int_to_ptr.vmem [resolvable:$false] %s565_s12 }
  0x16   : > { %p568_p1 = scmp.lt.s32.totalorder (!%p206_p10), %s782_s26, %s566_s12 }
  0x18   : > { %s247_s29 = scalar_select %p246_p11, %s663_s18, 1 }
  0x1a   : > { %s486_s30 = sshll.u32 %s247_s29, 3  ;;  %s772_s29 = scalar_lea.vmem [#allocation5], %s484_s21 }
  0x1b   : > { %s256_s7 = scalar_lea.vmem %s861_s1, %s486_s30  ;;  %s252_s10 = scalar_lea.vmem %s860_s0, %s486_s30 }
  0x1c   : > { %v262_v1 = vld [vmem:[%s256_s7] sm:$0xff]  ;;  %s260_s13 = scalar_lea.vmem %s862_s2, %s486_s30  ;;  %s353_s30 = sshll.u32 %s772_s29, 4  ;;  %s784_s30 = int_to_ptr.vmem [resolvable:$true] %s353_s30 }
  0x1d   : > { %269 = vperm.xlu0 %560, %v262_v1   ;;  %v261_v4 = vld [vmem:[%s252_s10] sm:$0xff]  ;;  %s780_s7 = scalar_lea.hbm %s863_s3, %s491_s22  ;;  %s561_s10 = scalar_lea.vmem %s782_s26, 128 }
  0x1e   : > { %v292_v8 = vld [vmem:[%s260_s13] sm:$0xff]  ;;  %p562_p12 = scmp.ne.s32.totalorder %s782_s26, %s561_s10  ;;  %s567_s13 = scalar_lea.vmem %s566_s12, 256 }
  0x1f   : > { %v309_v13 = vsel %vm279_vm1, %v292_v8, 0.0  ;;  %p569_p2 = scmp.lt.s32.totalorder %s567_s13, %s561_s10 }
  0x20   : > { %p563_p13 = pnand %p562_p12, %p741_p4 }
  0x21   : > { %p570_p3 = por %p569_p2, %p568_p1 }
  0x22   : > { %p564_p0 = pneg %p563_p13 }
  0x24   : > { %p571_p5 = pnand %p570_p3, %p564_p0 }
  0x9c   : > { %v270_v5 = vpop.permute.xlu0 %269 }
  0x9d   : > { %vm271_vm0 = vcmp.eq.s32.totalorder %v267_v3, %v270_v5 }
  0x9e   : > { %v272_v6 = vsel %vm271_vm0, %v261_v4, 0.0 }
  0x9f   : > { %273 = vadd.xlane.f32.xlu0 %v272_v6 }
 0x12c   : > { %v274_v7 = vpop.xlane.xlu0 %273 }
 0x12d   : > { %280 = vst.msk [vmem:[#allocation2] sm:$0xff] %vm279_vm1, %v274_v7 }
 0x134   : > { %v293_v9 = vld [vmem:[#allocation2] sm:$0xff] }
 0x135   : > { %v294_v10 = vsub.f32 0.0, %v293_v9 }
 0x137   : > { %v295_v11 = vmul.f32 %v294_v10, %v292_v8 }
 0x139   : > { %v297_v12 = vsel %vm279_vm1, %v295_v11, 0.0 }
 0x13a   : > { %298 = vadd.xlane.f32.xlu1 %v297_v12 }
 0x13e   : > { %310 = vadd.xlane.f32.xlu1 %v309_v13 }
 0x1c7   : > { %v299_v14 = vpop.xlane.xlu1 %298 }
 0x1c8   : > { %v300_v15 = vrot.slane %v299_v14, 4 }
 0x1ca   : > { %v301_v16 = vadd.f32 %v300_v15, %v299_v14 }
 0x1cb   : > { %v311_v17 = vpop.xlane.xlu1 %310 }
 0x1cc   : > { %v302_v18 = vrot.slane %v301_v16, 2  ;;  %v312_v19 = vrot.slane %v311_v17, 4 }
 0x1ce   : > { %v313_v20 = vadd.f32 %v312_v19, %v311_v17  ;;  %v303_v21 = vadd.f32 %v302_v18, %v301_v16 }
 0x1d0   : > { %v314_v22 = vrot.slane %v313_v20, 2  ;;  %v304_v23 = vrot.slane %v303_v21, 1 }
 0x1d2   : > { %v315_v24 = vadd.f32 %v314_v22, %v313_v20  ;;  %v305_v25 = vadd.f32 %v304_v23, %v303_v21 }
 0x1d4   : > { %495 = vpush %v305_v25  ;;  %v316_v26 = vrot.slane %v315_v24, 1 }
 0x1d6   : > { %v317_v27 = vadd.f32 %v316_v26, %v315_v24 }
 0x1d8   : > { %497 = vpush %v317_v27 }
 0x205   : > { %s496_s8 = spop %495 }
 0x206   : > { %v307_v28 = vstv %s496_s8 }
 0x207   : > { %308 = vst [vmem:[%s238_s24] sm:$0xff] %v307_v28 }
 0x208   : > { %574 = shalt.err (!%p571_p5)
}
 0x209   : > { %s575_s21 = scalar_lea.hbm %s780_s7, 128  ;;  %s579_s6 = scalar_lea.hbm %s863_s3, 256 }
 0x20a   : > { %p576_p6 = scmp.ne.s32.totalorder %s780_s7, %s575_s21  ;;  %p580_p10 = scmp.lt.u32.totalorder %s780_s7, %s863_s3 }
 0x20b   : > { %p581_p11 = scmp.lt.u32.totalorder %s579_s6, %s575_s21  ;;  %p583_p13 = scmp.lt.u32.totalorder %s575_s21, %s780_s7 }
 0x20c   : > { %p577_p7 = pnand %p576_p6, %p741_p4 }
 0x20d   : > { %p582_p12 = por %p581_p11, %p580_p10 }
 0x20e   : > { %p578_p9 = pneg %p577_p7 }
 0x20f   : > { %p584_p0 = por %p583_p13, %p582_p12 }
 0x211   : > { %p585_p1 = pnand %p584_p0, %p578_p9 }
 0x213   : > { %588 = shalt.err (!%p585_p1)
}
 0x214   : > { %499 = dma.vmem_to_hbm [thread:$0]  (%p741_p4), %s782_s26, 128, %s780_s7, %s322_s9  }
 0x215   : > { %s498_s10 = spop %497  ;;  %s813_s21 = scalar_lea.hbm %s864_s4, %s491_s22 }
 0x216   : > { %v319_v29 = vstv %s498_s10  ;;  %s327_s24 = scalar_lea.sflag [#allocation6], %s768_s14  ;;  %s589_s5 = scalar_lea.vmem %s784_s30, 128 }
 0x217   : > { %320 = vst [vmem:[%s772_s29] sm:$0xff] %v319_v29  ;;  %p590_p2 = scmp.ne.s32.totalorder %s784_s30, %s589_s5  ;;  %s675_s6 = smov [#allocation5]  }
 0x218   : > { %s593_s8 = sshll.u32 %s675_s6, 4  ;;  %s594_s8 = int_to_ptr.vmem [resolvable:$false] %s593_s8 }
 0x219   : > { %p591_p3 = pnand %p590_p2, %p741_p4  ;;  %s595_s11 = scalar_lea.vmem %s594_s8, 256 }
 0x21a   : > { %p596_p6 = scmp.lt.s32.totalorder %s784_s30, %s594_s8  ;;  %p597_p7 = scmp.lt.s32.totalorder %s595_s11, %s589_s5 }
 0x21b   : > { %p592_p5 = pneg %p591_p3 }
 0x21c   : > { %p598_p9 = por %p597_p7, %p596_p6 }
 0x21e   : > { %p599_p10 = pnand %p598_p9, %p592_p5 }
 0x220   : > { %602 = shalt.err (!%p599_p10)
}
 0x221   : > { %s603_s18 = scalar_lea.hbm %s813_s21, 128  ;;  %s607_s26 = scalar_lea.hbm %s864_s4, 256 }
 0x222   : > { %p604_p11 = scmp.ne.s32.totalorder %s813_s21, %s603_s18  ;;  %p608_p0 = scmp.lt.u32.totalorder %s813_s21, %s864_s4 }
 0x223   : > { %p609_p1 = scmp.lt.u32.totalorder %s607_s26, %s603_s18  ;;  %p611_p3 = scmp.lt.u32.totalorder %s603_s18, %s813_s21 }
 0x224   : > { %p605_p12 = pnand %p604_p11, %p741_p4 }
 0x225   : > { %p610_p2 = por %p609_p1, %p608_p0 }
 0x226   : > { %p606_p13 = pneg %p605_p12 }
 0x227   : > { %p612_p5 = por %p611_p3, %p610_p2 }
 0x229   : > { %p613_p6 = pnand %p612_p5, %p606_p13 }
 0x22b   : > { %616 = shalt.err (!%p613_p6)
}
 0x22c   : > { %500 = dma.vmem_to_hbm [thread:$0]  (%p741_p4), %s784_s30, 128, %s813_s21, %s327_s24  }
 0x22d PF: > { %p510_p7 = scmp.ge.s32.totalorder %s671_s20, 2  ;;  %s365_s9 = sand.u32 1, %s651_s15  }
 0x22e   : > { %s366_s10 = scalar_lea.sflag [#allocation4], %s365_s9 }
 0x22f   : > { %p504_p9 = pnand %p510_p7, %p748_p8 }
 0x231   : > { %642 = dma.done.wait (!%p504_p9), %s366_s10, 128  }
 0x232   : > { %644 = vsyncadd (!%p504_p9), %s366_s10, 4294967168  ;;  %s375_s12 = scalar_lea.sflag [#allocation6], %s365_s9 }
 0x233   : > { %646 = dma.done.wait (!%p504_p9), %s375_s12, 128  }
 0x234   : > { %648 = vsyncadd (!%p504_p9), %s375_s12, 4294967168  ;;  %s21_s20 = sadd.s32 1, %s671_s20   ;;  %s867_s15 = smov %s655_s16 }
 0x235   : > { %p18_p10 = scmp.ge.s32.totalorder %s21_s20, 4   ;;  %s868_s16 = smov %s659_s17 }
 0x236   : > { %s869_s17 = smov %s754_s28  ;;  %s870_s18 = smov %s667_s19 }
 0x237   : > { %s871_s19 = smov %s873_s23  ;;  %20 = sbr.rel (!%p18_p10) target bundleno = 6 (0x6), region = 102 }
 0x23e   :  { %380 = vsyncpa [#allocation4], 1 }
 0x23f   :  { %382 = vsyncpa [#allocation4 + $0x1], 1 }
 0x240   :  { %383 = vsyncpa [#allocation6], 1 }
 0x241   :  { %385 = vsyncpa [#allocation6 + $0x1], 1 }

</bundles_post_ra>
